<compile_context>
chip_gen: v7x
topology: tpu7x:2x2x1
jax: 0.10.0
libtpu: 0.0.40
codegen_flags: <defaults>
</compile_context>

<pallas_src>
import functools

import numpy as np
import jax
import jax.numpy as jnp
from jax.experimental import pallas as pl
from jax.experimental.pallas import tpu as pltpu


# ----------------------------------------------------------------------------
# Char CNN + feature assembly: banded-matmul conv -> max -> tanh, written into
# the lane slice of the lane-dense (N, Dpad) bf16 encoder-input slab.
# ----------------------------------------------------------------------------

def _feat_kernel(other_ref, char_ref, w_ref, b_ref, o_ref, *,
                 t_out, c_out, d_word):
    # char_ref: (TN, Lc*Cin) bf16, w_ref: (Lc*Cin, t_out*Cout) bf16 banded
    # Toeplitz (zero taps encode the Conv1d zero padding).
    y = jnp.dot(char_ref[...], w_ref[...],
                preferred_element_type=jnp.float32)       # (TN, t_out*Cout)
    # unrolled max over time: stays on the VPU, no strided relayout
    m = y[:, 0:c_out]
    for t in range(1, t_out):
        m = jnp.maximum(m, y[:, t * c_out:(t + 1) * c_out])
    char_feat = jnp.tanh(m + b_ref[...])                  # (TN, Cout) f32
    # other_ref already holds [word | 0(char slot) | pos | ner | 0-pad]
    o_ref[...] = other_ref[...]
    o_ref[:, d_word:d_word + c_out] = char_feat.astype(o_ref.dtype)


def encoder_features(other_padded, char_flat, conv_w2, conv_b,
                     t_out, c_out, d_word):
    """other_padded: (N, Dpad) bf16, char_flat: (N, Lc*Cin) bf16 -> (N, Dpad) bf16."""
    N, Dpad = other_padded.shape
    F = char_flat.shape[1]
    TN = min(N, 512)                      # large tile: ~85% of HBM roofline
    grid_n = pl.cdiv(N, TN)
    kernel = functools.partial(_feat_kernel, t_out=t_out, c_out=c_out,
                               d_word=d_word)
    return pl.pallas_call(
        kernel,
        out_shape=jax.ShapeDtypeStruct((N, Dpad), jnp.bfloat16),
        grid=(grid_n,),
        in_specs=[pl.BlockSpec((TN, Dpad), lambda i: (i, 0)),
                  pl.BlockSpec((TN, F), lambda i: (i, 0)),
                  pl.BlockSpec((F, t_out * c_out), lambda i: (0, 0)),
                  pl.BlockSpec((1, c_out), lambda i: (0, 0))],
        out_specs=pl.BlockSpec((TN, Dpad), lambda i: (i, 0)),
        compiler_params=pltpu.CompilerParams(
            dimension_semantics=("parallel",)),
    )(other_padded, char_flat, conv_w2, conv_b)


# ----------------------------------------------------------------------------
# Fused bidirectional masked LSTM stack (ALL layers in one pallas_call)
# ----------------------------------------------------------------------------

def _lstm_stack_kernel(*refs, num_layers, T, B, H, unroll):
    x_ref = refs[0]
    layer_refs = refs[1:1 + 3 * num_layers]
    mask_ref = refs[1 + 3 * num_layers]          # (T*B, 2H): [m(t) | m(T-1-t)]
    o_ref = refs[2 + 3 * num_layers]
    gx_sc = refs[3 + 3 * num_layers]             # (T*B, 8H) f32 scratch
    act_sc = refs[4 + 3 * num_layers]            # (T*B, 2H) f32 inter-layer

    G = 8 * H
    # hoisted lane selector: even H-blocks = forward-direction gate columns
    col_g = jax.lax.broadcasted_iota(jnp.int32, (1, G), 1)
    is_fwd_gate = (col_g // H) % 2 == 0

    for l in range(num_layers):
        wih_ref = layer_refs[3 * l]
        bias_ref = layer_refs[3 * l + 1]
        whh_ref = layer_refs[3 * l + 2]
        last = (l == num_layers - 1)
        out_ref = o_ref if last else act_sc

        # fused fwd+bwd input projection for all timesteps (one bf16 matmul)
        x_in = x_ref[...] if l == 0 else act_sc[...].astype(jnp.bfloat16)
        gx_sc[...] = (jnp.dot(x_in, wih_ref[...],
                              preferred_element_type=jnp.float32)
                      + bias_ref[...])
        whh = whh_ref[...]                        # (2H, 8H) bf16 block-diag

        def step(s, carry):
            h, c = carry                          # (B, 2H) f32 = [fwd | bwd]
            tf = s
            tb = T - 1 - s
            row_f = pl.multiple_of(tf * B, 8)     # B is padded to 8 sublanes
            row_b = pl.multiple_of(tb * B, 8)
            gx_f = gx_sc[pl.ds(row_f, B), :]
            gx_b = gx_sc[pl.ds(row_b, B), :]
            gates = (jnp.where(is_fwd_gate, gx_f, gx_b)
                     + jnp.dot(h.astype(whh.dtype), whh,
                               preferred_element_type=jnp.float32))
            # gate order [i_f,i_b,f_f,f_b,o_f,o_b,g_f,g_b]: 2 EUP regions
            sg = jax.nn.sigmoid(gates[:, 0:6 * H])
            g = jnp.tanh(gates[:, 6 * H:8 * H])
            i = sg[:, 0:2 * H]
            f = sg[:, 2 * H:4 * H]
            o = sg[:, 4 * H:6 * H]
            c_new = f * c + i * g
            h_new = o * jnp.tanh(c_new)

            m = mask_ref[pl.ds(row_f, B), :]      # (B, 2H) prebroadcast mask
            h = h + (h_new - h) * m               # masked-step semantics
            c = c + (c_new - c) * m

            out_ref[pl.ds(row_f, B), pl.ds(0, H)] = h[:, 0:H]      # fwd @ tf
            out_ref[pl.ds(row_b, B), pl.ds(H, H)] = h[:, H:2 * H]  # bwd @ tb
            return h, c

        zeros = jnp.zeros((B, 2 * H), jnp.float32)
        jax.lax.fori_loop(0, T, step, (zeros, zeros), unroll=unroll)


def bilstm_stack(x_tm, layers, mask_comb, T, Bp, H):
    """x_tm: (T*Bp, Dpad) bf16 time-major rows -> (T*Bp, 2H) f32."""
    N, Dpad = x_tm.shape
    G = 8 * H
    L = len(layers)
    unroll = T if T <= 16 else 8
    kernel = functools.partial(_lstm_stack_kernel, num_layers=L, T=T, B=Bp,
                               H=H, unroll=unroll)

    in_specs = [pl.BlockSpec((N, Dpad), lambda i: (0, 0))]
    operands = [x_tm]
    for layer in layers:
        for name in ("w_ih", "bias", "w_hh"):
            arr = layer[name]
            in_specs.append(pl.BlockSpec(arr.shape, lambda i: (0, 0)))
            operands.append(arr)
    in_specs.append(pl.BlockSpec((N, 2 * H), lambda i: (0, 0)))
    operands.append(mask_comb)

    return pl.pallas_call(
        kernel,
        out_shape=jax.ShapeDtypeStruct((N, 2 * H), jnp.float32),
        grid=(1,),
        in_specs=in_specs,
        out_specs=pl.BlockSpec((N, 2 * H), lambda i: (0, 0)),
        scratch_shapes=[pltpu.VMEM((N, G), jnp.float32),
                        pltpu.VMEM((N, 2 * H), jnp.float32)],
        compiler_params=pltpu.CompilerParams(
            dimension_semantics=("arbitrary",),
            vmem_limit_bytes=32 * 1024 * 1024),
    )(*operands)


# ----------------------------------------------------------------------------
# BaseEncoder forward (glue in plain JAX, hot paths in Pallas)
# ----------------------------------------------------------------------------

def base_encoder_forward(params, input_word, input_char, input_pos, input_ner,
                         mask):
    B, T = input_word.shape
    Lc = input_char.shape[2]
    H = params["hid_size"]
    Bp = ((B + 7) // 8) * 8                       # pad batch to 8 sublanes
    N = T * Bp

    # embedding lookups (gather - glue)
    word = params["emb_word"][input_word]         # (B, T, Dw)
    pos = params["emb_pos"][input_pos]            # (B, T, Dp)
    ner = params["emb_ner"][input_ner]            # (B, T, Dn)
    char = params["emb_char"][input_char]         # (B, T, Lc, Dc)

    def to_tm(a):                                  # (B, T, ...) -> (T, Bp, ...)
        a = jnp.swapaxes(a, 0, 1)
        pad = [(0, 0)] * a.ndim
        pad[1] = (0, Bp - B)
        return jnp.pad(a, pad)

    Dw, Dp, Dn = word.shape[-1], pos.shape[-1], ner.shape[-1]
    Cout = params["num_filters"]
    Dpad = params["d_in_pad"]
    D = Dw + Cout + Dp + Dn

    word_tm = to_tm(word).reshape(N, Dw)
    pos_tm = to_tm(pos).reshape(N, Dp)
    ner_tm = to_tm(ner).reshape(N, Dn)
    char_tm = to_tm(char).reshape(N, Lc * char.shape[-1]).astype(jnp.bfloat16)

    # [word | 0(char slot) | pos | ner | 0-pad] -> lane-dense 128-wide slab
    other_padded = jnp.concatenate(
        [word_tm, jnp.zeros((N, Cout), word_tm.dtype), pos_tm, ner_tm,
         jnp.zeros((N, Dpad - D), word_tm.dtype)], axis=1).astype(jnp.bfloat16)

    # TODO(synk): dropout layers are identity (eval-mode semantics).
    x_tm = encoder_features(other_padded, char_tm, params["conv_w2"],
                            params["conv_b"], params["conv_t_out"], Cout, Dw)

    # combined per-step mask: row (t*Bp+b) = [mask[b,t]*H | mask[b,T-1-t]*H]
    mask_p = jnp.pad(mask.astype(jnp.float32), ((0, Bp - B), (0, 0)))  # (Bp,T)
    mt = mask_p.T                                                      # (T,Bp)
    m_fwd = jnp.broadcast_to(mt[:, :, None], (T, Bp, H))
    m_bwd = jnp.broadcast_to(mt[::-1, :, None], (T, Bp, H))
    mask_comb = jnp.concatenate([m_fwd, m_bwd], axis=-1).reshape(N, 2 * H)

    out_tm = bilstm_stack(x_tm, params["lstm_layers"], mask_comb, T, Bp, H)

    # final dropout is identity (eval mode)
    return out_tm.reshape(T, Bp, 2 * H)[:, :B].transpose(1, 0, 2)  # (B,T,2H)


# ----------------------------------------------------------------------------
# Parameter construction (PyTorch-shaped) + one-time packing for the kernels
# ----------------------------------------------------------------------------

def make_params(key, *, hid_size=32, word_dim=16, char_dim=8, pos_dim=8,
                ner_dim=8, num_filters=16, kernel_size=3, num_layers=3,
                word_vocab=50, char_vocab=30, pos_vocab=12, ner_vocab=9):
    ks = iter(jax.random.split(key, 64))
    s = 0.1

    def nrm(shape):
        return jax.random.normal(next(ks), shape, jnp.float32) * s

    params = {
        "hid_size": hid_size,
        "kernel_size": kernel_size,
        "emb_word": nrm((word_vocab, word_dim)),
        "emb_char": nrm((char_vocab, char_dim)),
        "emb_pos": nrm((pos_vocab, pos_dim)),
        "emb_ner": nrm((ner_vocab, ner_dim)),
        # conv weight stored as (K, C_in, C_out) (= PyTorch (C_out, C_in, K).T)
        "conv_w": nrm((kernel_size, char_dim, num_filters)),
        "conv_b": nrm((num_filters,)),
    }
    dim_enc = word_dim + pos_dim + num_filters + ner_dim
    layers = []
    for l in range(num_layers):
        d_in = dim_enc if l == 0 else 2 * hid_size
        layers.append({
            "W_ih_f": nrm((4 * hid_size, d_in)),
            "W_hh_f": nrm((4 * hid_size, hid_size)),
            "b_ih_f": nrm((4 * hid_size,)),
            "b_hh_f": nrm((4 * hid_size,)),
            "W_ih_b": nrm((4 * hid_size, d_in)),
            "W_hh_b": nrm((4 * hid_size, hid_size)),
            "b_ih_b": nrm((4 * hid_size,)),
            "b_hh_b": nrm((4 * hid_size,)),
        })
    params["lstm_layers"] = layers
    return params


def _build_conv_banded_weight(conv_w, Lc):
    """conv_w: (K, Cin, Cout) -> banded (Lc*Cin, T_out*Cout) bf16, T_out.

    Zero rows/taps encode the Conv1d(padding=K-1) zero padding, so the whole
    conv reduces to one matmul with no runtime jnp.pad or im2col shuffles.
    """
    cw = np.asarray(conv_w, np.float32)
    K, Cin, Cout = cw.shape
    pad = K - 1
    t_out = Lc + K - 1
    W = np.zeros((Lc, Cin, t_out, Cout), np.float32)
    for t in range(t_out):
        for k in range(K):
            l = t - pad + k
            if 0 <= l < Lc:
                W[l, :, t, :] = cw[k]
    return jnp.asarray(W.reshape(Lc * Cin, t_out * Cout), jnp.bfloat16), t_out


# kernel column-block order [i, f, o, g] per direction (PyTorch order i,f,g,o)
_GATE_ORDER = (0, 1, 3, 2)


def _pack_bilstm_layer(layer, H, d_in_pad=None):
    """Pack fwd/bwd PyTorch-style LSTM weights into the fused kernel layout.

    Gate-column order on the 8H axis: [i_f,i_b,f_f,f_b,o_f,o_b,g_f,g_b]
    (even H-blocks = forward direction; sigmoid gates contiguous in 0:6H).
    w_hh is block-diagonal so the hidden matmul of both directions is a single
    [h_f|h_b] @ w_hh.  Layer-0 w_ih rows are zero-padded to d_in_pad to match
    the lane-dense padded encoder input.
    """
    def gate_rows(w):      # (4H, X) -> 4 x (H, X), PyTorch order i,f,g,o
        w = np.asarray(w, np.float32)
        return [w[q * H:(q + 1) * H] for q in range(4)]

    wih_f, wih_b = gate_rows(layer["W_ih_f"]), gate_rows(layer["W_ih_b"])
    whh_f, whh_b = gate_rows(layer["W_hh_f"]), gate_rows(layer["W_hh_b"])
    bf = np.asarray(layer["b_ih_f"], np.float32) + np.asarray(layer["b_hh_f"],
                                                              np.float32)
    bb = np.asarray(layer["b_ih_b"], np.float32) + np.asarray(layer["b_hh_b"],
                                                              np.float32)

    w_ih = np.concatenate(
        [np.concatenate([wih_f[q].T, wih_b[q].T], axis=1) for q in _GATE_ORDER],
        axis=1)                                              # (d_in, 8H)
    bias = np.concatenate(
        [np.concatenate([bf[q * H:(q + 1) * H], bb[q * H:(q + 1) * H]])
         for q in _GATE_ORDER])                              # (8H,)
    w_hh = np.zeros((2 * H, 8 * H), np.float32)              # block-diagonal
    for j, q in enumerate(_GATE_ORDER):
        w_hh[0:H, (2 * j) * H:(2 * j + 1) * H] = whh_f[q].T
        w_hh[H:2 * H, (2 * j + 1) * H:(2 * j + 2) * H] = whh_b[q].T

    if d_in_pad is not None and d_in_pad > w_ih.shape[0]:
        w_ih = np.concatenate(
            [w_ih, np.zeros((d_in_pad - w_ih.shape[0], 8 * H), np.float32)],
            axis=0)

    return {"w_ih": jnp.asarray(w_ih, jnp.bfloat16),
            "bias": jnp.asarray(bias.reshape(1, -1), jnp.float32),
            "w_hh": jnp.asarray(w_hh, jnp.bfloat16)}


def prepare_params(raw, Lc):
    """One-time packing of PyTorch-shaped params into kernel-ready layout."""
    H = raw["hid_size"]
    conv_w2, t_out = _build_conv_banded_weight(raw["conv_w"], Lc)
    num_filters = int(raw["conv_b"].shape[0])
    dim_enc = (raw["emb_word"].shape[1] + num_filters
               + raw["emb_pos"].shape[1] + raw["emb_ner"].shape[1])
    d_in_pad = ((dim_enc + 127) // 128) * 128     # lane-dense encoder input
    layers = []
    for l, layer in enumerate(raw["lstm_layers"]):
        layers.append(_pack_bilstm_layer(layer, H,
                                         d_in_pad=d_in_pad if l == 0 else None))
    return {
        "hid_size": H,
        "num_filters": num_filters,
        "d_in_pad": d_in_pad,
        "conv_w2": conv_w2,
        "conv_b": jnp.asarray(raw["conv_b"]).reshape(1, -1),
        "conv_t_out": t_out,
        "emb_word": raw["emb_word"],
        "emb_char": raw["emb_char"],
        "emb_pos": raw["emb_pos"],
        "emb_ner": raw["emb_ner"],
        "lstm_layers": layers,
    }


if __name__ == "__main__":
    B, T, Lc = 2, 8, 6
    key = jax.random.PRNGKey(0)
    kp, kw, kc, kpo, kn = jax.random.split(key, 5)

    raw = make_params(kp)
    params = prepare_params(raw, Lc)

    input_word = jax.random.randint(kw, (B, T), 0, 50)
    input_char = jax.random.randint(kc, (B, T, Lc), 0, 30)
    input_pos = jax.random.randint(kpo, (B, T), 0, 12)
    input_ner = jax.random.randint(kn, (B, T), 0, 9)
    # mask: first sequence full, second one padded at the end
    mask = jnp.array([[1] * T, [1] * (T - 3) + [0] * 3], dtype=jnp.float32)

    out = base_encoder_forward(params, input_word, input_char, input_pos,
                               input_ner, mask)
    out = jax.block_until_ready(out)
    assert out.shape == (B, T, 2 * params["hid_size"]), out.shape
    assert jnp.all(jnp.isfinite(out))
    print("KERNEL_OK")
</pallas_src>

<mosaic_0001>
module attributes {stable_mosaic.version = 11 : i64} {
  func.func @_feat_kernel(%arg0: i32, %arg1: memref<64x128xbf16, #tpu.memory_space<vmem>>, %arg2: memref<64x48xbf16, #tpu.memory_space<vmem>>, %arg3: memref<48x128xbf16, #tpu.memory_space<vmem>>, %arg4: memref<1x16xf32, #tpu.memory_space<vmem>>, %arg5: memref<64x128xbf16, #tpu.memory_space<vmem>>) attributes {dimension_semantics = [#tpu.dimension_semantics<parallel>], iteration_bounds = array<i64: 1>, scalar_prefetch = 0 : i64, scratch_operands = 0 : i64, tpu.core_type = #tpu.core_type<tc>, window_params = [{transform_indices = @transform_0, window_bounds = array<i64: 64, 128>}, {transform_indices = @transform_1, window_bounds = array<i64: 64, 48>}, {pipeline_mode = #tpu.pipeline_mode<synchronous>, transform_indices = @transform_2, window_bounds = array<i64: 48, 128>}, {pipeline_mode = #tpu.pipeline_mode<synchronous>, transform_indices = @transform_3, window_bounds = array<i64: 1, 16>}, {transform_indices = @transform_4, window_bounds = array<i64: 64, 128>}]} {
    %c0 = arith.constant 0 : index
    %c0_0 = arith.constant 0 : index
    %0 = vector.load %arg2[%c0, %c0_0] : memref<64x48xbf16, #tpu.memory_space<vmem>>, vector<64x48xbf16>
    %c0_1 = arith.constant 0 : index
    %c0_2 = arith.constant 0 : index
    %1 = vector.load %arg3[%c0_1, %c0_2] : memref<48x128xbf16, #tpu.memory_space<vmem>>, vector<48x128xbf16>
    %cst = arith.constant dense<0.000000e+00> : vector<64x128xf32>
    %2 = tpu.matmul %0, %1, %cst {dimension_numbers = #tpu.dot_dimension_numbers<[1], [0], [0], [1], [0, 0, 1, 1], [], []>} : vector<64x48xbf16>, vector<48x128xbf16>, vector<64x128xf32> -> vector<64x128xf32>
    %3 = vector.extract_strided_slice %2 {offsets = [0, 0], sizes = [64, 16], strides = [1, 1]} : vector<64x128xf32> to vector<64x16xf32>
    %4 = vector.extract_strided_slice %2 {offsets = [0, 16], sizes = [64, 16], strides = [1, 1]} : vector<64x128xf32> to vector<64x16xf32>
    %5 = arith.maximumf %3, %4 : vector<64x16xf32>
    %6 = vector.extract_strided_slice %2 {offsets = [0, 32], sizes = [64, 16], strides = [1, 1]} : vector<64x128xf32> to vector<64x16xf32>
    %7 = arith.maximumf %5, %6 : vector<64x16xf32>
    %8 = vector.extract_strided_slice %2 {offsets = [0, 48], sizes = [64, 16], strides = [1, 1]} : vector<64x128xf32> to vector<64x16xf32>
    %9 = arith.maximumf %7, %8 : vector<64x16xf32>
    %10 = vector.extract_strided_slice %2 {offsets = [0, 64], sizes = [64, 16], strides = [1, 1]} : vector<64x128xf32> to vector<64x16xf32>
    %11 = arith.maximumf %9, %10 : vector<64x16xf32>
    %12 = vector.extract_strided_slice %2 {offsets = [0, 80], sizes = [64, 16], strides = [1, 1]} : vector<64x128xf32> to vector<64x16xf32>
    %13 = arith.maximumf %11, %12 : vector<64x16xf32>
    %14 = vector.extract_strided_slice %2 {offsets = [0, 96], sizes = [64, 16], strides = [1, 1]} : vector<64x128xf32> to vector<64x16xf32>
    %15 = arith.maximumf %13, %14 : vector<64x16xf32>
    %16 = vector.extract_strided_slice %2 {offsets = [0, 112], sizes = [64, 16], strides = [1, 1]} : vector<64x128xf32> to vector<64x16xf32>
    %17 = arith.maximumf %15, %16 : vector<64x16xf32>
    %c0_3 = arith.constant 0 : index
    %c0_4 = arith.constant 0 : index
    %18 = vector.load %arg4[%c0_3, %c0_4] : memref<1x16xf32, #tpu.memory_space<vmem>>, vector<1x16xf32>
    %19 = vector.broadcast %18 : vector<1x16xf32> to vector<64x16xf32>
    %20 = arith.addf %17, %19 : vector<64x16xf32>
    %21 = math.tanh %20 : vector<64x16xf32>
    %c0_5 = arith.constant 0 : index
    %c0_6 = arith.constant 0 : index
    %22 = vector.load %arg1[%c0_5, %c0_6] : memref<64x128xbf16, #tpu.memory_space<vmem>>, vector<64x128xbf16>
    %c0_7 = arith.constant 0 : index
    %c0_8 = arith.constant 0 : index
    %23 = vector.load %arg5[%c0_7, %c0_8] : memref<64x128xbf16, #tpu.memory_space<vmem>>, vector<64x128xbf16>
    tpu.vector_store %arg5[%c0_7, %c0_8], %22 {strides = array<i32>} : memref<64x128xbf16, #tpu.memory_space<vmem>>, vector<64x128xbf16>,
    %24 = arith.truncf %21 : vector<64x16xf32> to vector<64x16xbf16>
    %c0_9 = arith.constant 0 : index
    %c16 = arith.constant 16 : index
    %25 = vector.load %arg5[%c0_9, %c16] : memref<64x128xbf16, #tpu.memory_space<vmem>>, vector<64x16xbf16>
    tpu.vector_store %arg5[%c0_9, %c16], %24 {strides = array<i32>} : memref<64x128xbf16, #tpu.memory_space<vmem>>, vector<64x16xbf16>,
    return
  }
  func.func @transform_0(%arg0: i32) -> (i32, i32) {
    %c0_i32 = arith.constant 0 : i32
    %c0_i32_0 = arith.constant 0 : i32
    return %arg0, %c0_i32 : i32, i32
  }
  func.func @transform_1(%arg0: i32) -> (i32, i32) {
    %c0_i32 = arith.constant 0 : i32
    %c0_i32_0 = arith.constant 0 : i32
    return %arg0, %c0_i32 : i32, i32
  }
  func.func @transform_2(%arg0: i32) -> (i32, i32) {
    %c0_i32 = arith.constant 0 : i32
    %c0_i32_0 = arith.constant 0 : i32
    %c0_i32_1 = arith.constant 0 : i32
    return %c0_i32, %c0_i32_0 : i32, i32
  }
  func.func @transform_3(%arg0: i32) -> (i32, i32) {
    %c0_i32 = arith.constant 0 : i32
    %c0_i32_0 = arith.constant 0 : i32
    %c0_i32_1 = arith.constant 0 : i32
    return %c0_i32, %c0_i32_0 : i32, i32
  }
  func.func @transform_4(%arg0: i32) -> (i32, i32) {
    %c0_i32 = arith.constant 0 : i32
    %c0_i32_0 = arith.constant 0 : i32
    return %arg0, %c0_i32 : i32, i32
  }
}

</mosaic_0001>

<bundles_post_ra>
// kernel: tpu_custom_call.1
= control target key start
LH: loop header
LB: loop body
LE: loop exit
PB: predicated region body
PF: predicated region fallthrough
CT: control target
= control target key end

     0   :  { %vm71_vm0 = vcmask 392192   ;;  %s875_s0 = inlined_call_operand.vmem [shape: bf16[64,128], index: 0, kind: input, shape index: {}]   ;;  %s876_s1 = inlined_call_operand.vmem [shape: bf16[64,48], index: 1, kind: input, shape index: {}]   ;;  %s877_s2 = inlined_call_operand.vmem [shape: bf16[48,128], index: 2, kind: input, shape index: {}]   ;;  %s878_s3 = inlined_call_operand.vmem [shape: f32[1,16], index: 3, kind: input, shape index: {}]   ;;  %s879_s4 = inlined_call_operand.hbm [shape: bf16[64,128], index: 4, kind: output, shape index: {}]  }
   0x1   :  { %v557_v0 = vld [vmem:[%s877_s2] sm:$0xff]   ;;  %v558_v1 = vld [vmem:[%s877_s2 + $0x8] sm:$0xff]   ;;  %v559_v2 = vld [vmem:[%s877_s2 + $0x10] sm:$0xff]  }
   0x2   :  { %528 = vmatprep.subr.bf16.mxu0 %v557_v0  ;;  %542 = vmatprep.subr.bf16.mxu1 %v557_v0  ;;  %v560_v3 = vld [vmem:[%s876_s1] sm:$0xff]   ;;  %v561_v4 = vld [vmem:[%s876_s1 + $0x10] sm:$0xff]  }
   0x3   :  { %529 = vmatpush3.bf16.msra.mxu0 %v557_v0  ;;  %545 = vmatpush3.bf16.msra.mxu1 %v557_v0 }
   0x4   :  { %530 = vmatprep.subr.bf16.mxu0 %v558_v1  ;;  %543 = vmatprep.subr.bf16.mxu1 %v558_v1 }
   0x5   :  { %534 = vmatprep.mubr.msk.bf16.mxu0 %vm71_vm0, %v560_v3  ;;  %538 = vmatprep.mubr.msk.bf16.mxu1 %vm71_vm0, %v561_v4 }
   0x7   :  { %531 = vmatpush3.bf16.msra.mxu0 %v558_v1  ;;  %546 = vmatpush3.bf16.msra.mxu1 %v558_v1 }
   0x8   :  { %9 = vsyncpa [#allocation3], 0  ;;  %532 = vmatprep.subr.bf16.mxu0 %v559_v2  ;;  %544 = vmatprep.subr.bf16.mxu1 %v559_v2  ;;  %v562_v5 = vld [vmem:[%s876_s1 + $0x8] sm:$0xff]   ;;  %v563_v6 = vld [vmem:[%s876_s1 + $0x18] sm:$0xff]   ;;  %s604_s28 = smov 112   ;;  %s605_s1 = smov 96  }
   0x9   :  { %s606_s29 = smov 80   ;;  %s607_s30 = smov 64   ;;  %v407_v22 = vld [vmem:[%s875_s0 + $0xc] sm:$0xff]   ;;  %vm468_vm1 = vcmask 257152  }
   0xa   :  { %s608_s5 = smov 48   ;;  %s609_s6 = smov 32   ;;  %415 = vst [vmem:[#allocation2 + $0xc] sm:$0xff] %v407_v22  }
   0xb   :  { %533 = vmatpush3.bf16.msra.mxu0 %v559_v2  ;;  %547 = vmatpush3.bf16.msra.mxu1 %v559_v2  ;;  %s610_s7 = smov 16   ;;  %v813_v2 = vld [vmem:[%s878_s3] ss:$0 sm:$0xff] }
   0xe   :  { %535 = vmatmul.mubr.msk.bf16.vlgmr.msra.gmra.mrb[0].mxu0 %vm71_vm0, %v562_v5  ;;  %539 = vmatmul.mubr.msk.bf16.vlgmr.msra.gmra.mrb[0].mxu1 %vm71_vm0, %v563_v6 }
  0xe1   :  { %v663_v7 = vpop.f32.mrb[0].mxu0  ;;  %v665_v8 = vpop.f32.mrb[0].mxu1 }
  0xe2   :  { %169 = vrot.lane.b32.xlu0 %v665_v8, %s604_s28  ;;  %v669_v9 = vpop.f32.mrb[1].mxu1  ;;  %161 = vrot.lane.b32.xlu1 %v663_v7, %s604_s28  ;;  %v673_v10 = vpop.f32.mrb[1].mxu0 }
  0xe3   :  { %v675_v11 = vpop.f32.mrb[2].mxu1  ;;  %v677_v12 = vpop.f32.mrb[2].mxu0 }
  0xe4   :  { %v679_v13 = vpop.f32.mrb[3].mxu1  ;;  %v681_v14 = vpop.f32.mrb[3].mxu0 }
  0xe6   :  { %193 = vrot.lane.b32.xlu0 %v663_v7, %s605_s1  ;;  %163 = vrot.lane.b32.xlu1 %v677_v12, %s604_s28 }
  0xea   :  { %201 = vrot.lane.b32.xlu0 %v665_v8, %s605_s1  ;;  %171 = vrot.lane.b32.xlu1 %v675_v11, %s604_s28 }
  0xee   :  { %225 = vrot.lane.b32.xlu0 %v663_v7, %s606_s29  ;;  %195 = vrot.lane.b32.xlu1 %v677_v12, %s605_s1 }
  0xf2   :  { %233 = vrot.lane.b32.xlu0 %v665_v8, %s606_s29  ;;  %203 = vrot.lane.b32.xlu1 %v675_v11, %s605_s1 }
  0xf6   :  { %257 = vrot.lane.b32.xlu0 %v663_v7, %s607_s30  ;;  %227 = vrot.lane.b32.xlu1 %v677_v12, %s606_s29 }
  0xfa   :  { %265 = vrot.lane.b32.xlu0 %v665_v8, %s607_s30  ;;  %235 = vrot.lane.b32.xlu1 %v675_v11, %s606_s29 }
  0xfe   :  { %289 = vrot.lane.b32.xlu0 %v663_v7, %s608_s5  ;;  %259 = vrot.lane.b32.xlu1 %v677_v12, %s607_s30 }
 0x102   :  { %297 = vrot.lane.b32.xlu0 %v665_v8, %s608_s5  ;;  %267 = vrot.lane.b32.xlu1 %v675_v11, %s607_s30 }
 0x106   :  { %321 = vrot.lane.b32.xlu0 %v663_v7, %s609_s6  ;;  %291 = vrot.lane.b32.xlu1 %v677_v12, %s608_s5 }
 0x10a   :  { %329 = vrot.lane.b32.xlu0 %v665_v8, %s609_s6  ;;  %299 = vrot.lane.b32.xlu1 %v675_v11, %s608_s5 }
 0x10e   :  { %157 = vrot.lane.b32.xlu0 %v673_v10, %s604_s28  ;;  %323 = vrot.lane.b32.xlu1 %v677_v12, %s609_s6 }
 0x112   :  { %165 = vrot.lane.b32.xlu0 %v669_v9, %s604_s28  ;;  %331 = vrot.lane.b32.xlu1 %v675_v11, %s609_s6 }
 0x116   :  { %189 = vrot.lane.b32.xlu0 %v673_v10, %s605_s1  ;;  %355 = vrot.lane.b32.xlu1 %v677_v12, %s610_s7 }
 0x11a   :  { %197 = vrot.lane.b32.xlu0 %v669_v9, %s605_s1  ;;  %167 = vrot.lane.b32.xlu1 %v679_v13, %s604_s28 }
 0x11e   :  { %221 = vrot.lane.b32.xlu0 %v673_v10, %s606_s29  ;;  %191 = vrot.lane.b32.xlu1 %v681_v14, %s605_s1 }
 0x122   :  { %229 = vrot.lane.b32.xlu0 %v669_v9, %s606_s29  ;;  %199 = vrot.lane.b32.xlu1 %v679_v13, %s605_s1 }
 0x126   :  { %253 = vrot.lane.b32.xlu0 %v673_v10, %s607_s30  ;;  %223 = vrot.lane.b32.xlu1 %v681_v14, %s606_s29 }
 0x12a   :  { %261 = vrot.lane.b32.xlu0 %v669_v9, %s607_s30  ;;  %231 = vrot.lane.b32.xlu1 %v679_v13, %s606_s29 }
 0x12e   :  { %285 = vrot.lane.b32.xlu0 %v673_v10, %s608_s5  ;;  %255 = vrot.lane.b32.xlu1 %v681_v14, %s607_s30 }
 0x132   :  { %293 = vrot.lane.b32.xlu0 %v669_v9, %s608_s5  ;;  %263 = vrot.lane.b32.xlu1 %v679_v13, %s607_s30 }
 0x136   :  { %317 = vrot.lane.b32.xlu0 %v673_v10, %s609_s6  ;;  %287 = vrot.lane.b32.xlu1 %v681_v14, %s608_s5 }
 0x13a   :  { %325 = vrot.lane.b32.xlu0 %v669_v9, %s609_s6  ;;  %295 = vrot.lane.b32.xlu1 %v679_v13, %s608_s5 }
 0x13e   :  { %349 = vrot.lane.b32.xlu0 %v673_v10, %s610_s7  ;;  %319 = vrot.lane.b32.xlu1 %v681_v14, %s609_s6 }
 0x142   :  { %327 = vrot.lane.b32.xlu1 %v679_v13, %s609_s6  ;;  %159 = vrot.lane.b32.xlu0 %v681_v14, %s604_s28 }
 0x146   :  { %351 = vrot.lane.b32.xlu1 %v681_v14, %s610_s7  ;;  %353 = vrot.lane.b32.xlu0 %v663_v7, %s610_s7 }
 0x14a   :  { %359 = vrot.lane.b32.xlu1 %v679_v13, %s610_s7  ;;  %357 = vrot.lane.b32.xlu0 %v669_v9, %s610_s7 }
 0x14e   :  { %363 = vrot.lane.b32.xlu1 %v675_v11, %s610_s7  ;;  %361 = vrot.lane.b32.xlu0 %v665_v8, %s610_s7 }
 0x154   :  { %v170_v15 = vpop.permute.xlu0 %169  ;;  %v162_v16 = vpop.permute.xlu1 %161 }
 0x155   :  { %v187_v17 = vmax.f32 %v665_v8, %v170_v15  ;;  %v183_v18 = vmax.f32 %v663_v7, %v162_v16  ;;  %v406_v8 = vld [vmem:[%s875_s0 + $0x8] sm:$0xf] }
 0x156   :  { %414 = vst [vmem:[#allocation2 + $0x8] sm:$0xf] %v406_v8 }
 0x158   :  { %v194_v19 = vpop.permute.xlu0 %193  ;;  %v164_v20 = vpop.permute.xlu1 %163 }
 0x159   :  { %v215_v21 = vmax.f32 %v183_v18, %v194_v19  ;;  %v184_v52 = vmax.f32 %v677_v12, %v164_v20 }
 0x15c   :  { %v202_v23 = vpop.permute.xlu0 %201  ;;  %v172_v24 = vpop.permute.xlu1 %171 }
 0x15d   :  { %v219_v25 = vmax.f32 %v187_v17, %v202_v23  ;;  %v188_v26 = vmax.f32 %v675_v11, %v172_v24 }
 0x160   :  { %v226_v27 = vpop.permute.xlu0 %225  ;;  %v196_v28 = vpop.permute.xlu1 %195 }
 0x161   :  { %v247_v29 = vmax.f32 %v215_v21, %v226_v27  ;;  %v216_v55 = vmax.f32 %v184_v52, %v196_v28 }
 0x164   :  { %v234_v30 = vpop.permute.xlu0 %233  ;;  %v204_v31 = vpop.permute.xlu1 %203 }
 0x165   :  { %v251_v32 = vmax.f32 %v219_v25, %v234_v30  ;;  %v220_v33 = vmax.f32 %v188_v26, %v204_v31 }
 0x168   :  { %v258_v34 = vpop.permute.xlu0 %257  ;;  %v228_v35 = vpop.permute.xlu1 %227 }
 0x169   :  { %v797_v36 = vmax.f32 %v247_v29, %v258_v34  ;;  %v248_v58 = vmax.f32 %v216_v55, %v228_v35 }
 0x16c   :  { %v266_v37 = vpop.permute.xlu0 %265  ;;  %v236_v38 = vpop.permute.xlu1 %235 }
 0x16d   :  { %v283_v39 = vmax.f32 %v251_v32, %v266_v37  ;;  %v252_v40 = vmax.f32 %v220_v33, %v236_v38 }
 0x170   :  { %v799_v41 = vpop.permute.xlu0 %289  ;;  %v260_v42 = vpop.permute.xlu1 %259 }
 0x171   :  { %v311_v43 = vmax.f32 %v797_v36, %v799_v41  ;;  %v280_v59 = vmax.f32 %v248_v58, %v260_v42 }
 0x174   :  { %v298_v44 = vpop.permute.xlu0 %297  ;;  %v268_v45 = vpop.permute.xlu1 %267 }
 0x175   :  { %v315_v46 = vmax.f32 %v283_v39, %v298_v44  ;;  %v284_v47 = vmax.f32 %v252_v40, %v268_v45 }
 0x178   :  { %v803_v48 = vpop.permute.xlu0 %321  ;;  %v292_v49 = vpop.permute.xlu1 %291 }
 0x179   :  { %v312_v62 = vmax.f32 %v280_v59, %v292_v49 }
 0x17c   :  { %v330_v50 = vpop.permute.xlu0 %329  ;;  %v300_v51 = vpop.permute.xlu1 %299 }
 0x17d   :  { %v806_v53 = vmax.f32 %v315_v46, %v330_v50  ;;  %v316_v54 = vmax.f32 %v284_v47, %v300_v51  ;;  %v343_v51 = vmax.f32 %v311_v43, %v803_v48  ;;  %v404_v48 = vld [vmem:[%s875_s0] sm:$0xff]  }
 0x17e   :  { %412 = vst [vmem:[#allocation2] sm:$0xff] %v404_v48  }
 0x180   :  { %v158_v56 = vpop.permute.xlu0 %157  ;;  %v324_v57 = vpop.permute.xlu1 %323 }
 0x181   :  { %v344_v0 = vmax.f32 %v312_v62, %v324_v57  ;;  %v181_v29 = vmax.f32 %v673_v10, %v158_v56 }
 0x184   :  { %v166_v60 = vpop.permute.xlu0 %165  ;;  %v332_v61 = vpop.permute.xlu1 %331 }
 0x185   :  { %v808_v63 = vmax.f32 %v316_v54, %v332_v61  ;;  %v185_v37 = vmax.f32 %v669_v9, %v166_v60 }
 0x188   :  { %v190_v1 = vpop.permute.xlu0 %189  ;;  %v356_v3 = vpop.permute.xlu1 %355 }
 0x189   :  { %v376_v4 = vmax.f32 %v344_v0, %v356_v3  ;;  %v213_v32 = vmax.f32 %v181_v29, %v190_v1 }
 0x18b   :  { %v391_v5 = vadd.f32 %v813_v2, %v376_v4 }
 0x18c   :  { %v198_v6 = vpop.permute.xlu0 %197  ;;  %v168_v7 = vpop.permute.xlu1 %167 }
 0x18d   :  { %564 = vtanh.f32 %v391_v5  ;;  %v186_v39 = vmax.f32 %v679_v13, %v168_v7  ;;  %v217_v40 = vmax.f32 %v185_v37, %v198_v6 }
 0x190   :  { %v222_v11 = vpop.permute.xlu0 %221  ;;  %v192_v12 = vpop.permute.xlu1 %191 }
 0x191   :  { %v245_v33 = vmax.f32 %v213_v32, %v222_v11 }
 0x194   :  { %v230_v15 = vpop.permute.xlu0 %229  ;;  %v200_v16 = vpop.permute.xlu1 %199 }
 0x195   :  { %v218_v44 = vmax.f32 %v186_v39, %v200_v16  ;;  %v249_v47 = vmax.f32 %v217_v40, %v230_v15 }
 0x197   :  { %v565_v17 = vpop.eup %564 }
 0x198   :  { %v254_v18 = vpop.permute.xlu0 %253  ;;  %v224_v19 = vpop.permute.xlu1 %223  ;;  %v516_v20 = vpack.c.bf16 %v565_v17, %v565_v17 }
 0x199   :  { %v277_v38 = vmax.f32 %v245_v33, %v254_v18 }
 0x19a   :  { %450 = vrot.lane.b32.xlu1 %v516_v20, %s610_s7  ;;  %v409_v20 = vld [vmem:[%s875_s0 + $0x14] sm:$0xff]  }
 0x19b   :  { %417 = vst [vmem:[#allocation2 + $0x14] sm:$0xff] %v409_v20  }
 0x19c   :  { %v262_v21 = vpop.permute.xlu0 %261  ;;  %v232_v22 = vpop.permute.xlu1 %231 }
 0x19d   :  { %v250_v50 = vmax.f32 %v218_v44, %v232_v22  ;;  %v281_v52 = vmax.f32 %v249_v47, %v262_v21  ;;  %v411_v22 = vld [vmem:[%s875_s0 + $0x1c] sm:$0xf]  ;;  %s611_s0 = smov [#allocation2]  }
 0x19e   :  { %419 = vst [vmem:[#allocation2 + $0x1c] sm:$0xf] %v411_v22  ;;  %s482_s19 = sshll.u32 %s611_s0, 4  ;;  %s483_s19 = int_to_ptr.vmem [resolvable:$true] %s482_s19 }
 0x19f   :  { %s580_s20 = scalar_lea.vmem %s483_s19, 512  ;;  %p585_p1 = scmp.lt.s32.totalorder %s483_s19, %s483_s19 }
 0x1a0   :  { %v286_v23 = vpop.permute.xlu0 %285  ;;  %v256_v24 = vpop.permute.xlu1 %255  ;;  %p581_p0 = scmp.ne.s32.totalorder %s483_s19, %s580_s20  ;;  %p586_p2 = scmp.lt.s32.totalorder %s580_s20, %s580_s20 }
 0x1a1   :  { %v309_v42 = vmax.f32 %v277_v38, %v286_v23 }
 0x1a2   :  { %p587_p3 = por %p586_p2, %p585_p1 }
 0x1a4   :  { %v294_v25 = vpop.permute.xlu0 %293  ;;  %v264_v26 = vpop.permute.xlu1 %263  ;;  %p588_p4 = pnand %p587_p3, %p581_p0 }
 0x1a5   :  { %v282_v55 = vmax.f32 %v250_v50, %v264_v26  ;;  %v313_v57 = vmax.f32 %v281_v52, %v294_v25 }
 0x1a8   :  { %v318_v27 = vpop.permute.xlu0 %317  ;;  %v288_v28 = vpop.permute.xlu1 %287 }
 0x1a9   :  { %v341_v49 = vmax.f32 %v309_v42, %v318_v27 }
 0x1ac   :  { %v326_v30 = vpop.permute.xlu0 %325  ;;  %v296_v31 = vpop.permute.xlu1 %295 }
 0x1ad   :  { %v314_v60 = vmax.f32 %v282_v55, %v296_v31  ;;  %v345_v61 = vmax.f32 %v313_v57, %v326_v30 }
 0x1b0   :  { %v350_v34 = vpop.permute.xlu0 %349  ;;  %v320_v35 = vpop.permute.xlu1 %319 }
 0x1b1   :  { %v373_v9 = vmax.f32 %v341_v49, %v350_v34 }
 0x1b3   :  { %v388_v62 = vadd.f32 %v813_v2, %v373_v9 }
 0x1b4   :  { %v328_v45 = vpop.permute.xlu1 %327  ;;  %v160_v46 = vpop.permute.xlu0 %159 }
 0x1b5   :  { %v182_v10 = vmax.f32 %v681_v14, %v160_v46  ;;  %v346_v1 = vmax.f32 %v314_v60, %v328_v45 }
 0x1b7   :  { %v214_v54 = vmax.f32 %v182_v10, %v192_v12 }
 0x1b8   :  { %v352_v13 = vpop.permute.xlu1 %351  ;;  %v354_v56 = vpop.permute.xlu0 %353 }
 0x1b9   :  { %v246_v58 = vmax.f32 %v214_v54, %v224_v19  ;;  %v375_v59 = vmax.f32 %v343_v51, %v354_v56 }
 0x1bb   :  { %v278_v14 = vmax.f32 %v246_v58, %v256_v24  ;;  %v390_v0 = vadd.f32 %v813_v2, %v375_v59 }
 0x1bc   :  { %v360_v3 = vpop.permute.xlu1 %359  ;;  %v358_v36 = vpop.permute.xlu0 %357 }
 0x1bd   :  { %v310_v41 = vmax.f32 %v278_v14, %v288_v28  ;;  %566 = vtanh.f32 %v390_v0  ;;  %v377_v43 = vmax.f32 %v345_v61, %v358_v36  ;;  %v378_v4 = vmax.f32 %v346_v1, %v360_v3 }
 0x1be   :  { %568 = vtanh.f32 %v388_v62 }
 0x1bf   :  { %v342_v5 = vmax.f32 %v310_v41, %v320_v35  ;;  %v392_v6 = vadd.f32 %v813_v2, %v377_v43  ;;  %v393_v16 = vadd.f32 %v813_v2, %v378_v4 }
 0x1c0   :  { %v364_v7 = vpop.permute.xlu1 %363  ;;  %v362_v8 = vpop.permute.xlu0 %361 }
 0x1c1   :  { %v374_v11 = vmax.f32 %v342_v5, %v352_v13  ;;  %v380_v12 = vmax.f32 %v808_v63, %v364_v7  ;;  %v379_v15 = vmax.f32 %v806_v53, %v362_v8  ;;  %570 = vtanh.f32 %v392_v6 }
 0x1c3   :  { %v389_v17 = vadd.f32 %v813_v2, %v374_v11  ;;  %v395_v18 = vadd.f32 %v813_v2, %v380_v12  ;;  %v394_v19 = vadd.f32 %v813_v2, %v379_v15 }
 0x1c5   :  { %572 = vtanh.f32 %v389_v17 }
 0x1c6   :  { %574 = vtanh.f32 %v393_v16 }
 0x1c7   :  { %v567_v21 = vpop.eup %566  ;;  %576 = vtanh.f32 %v394_v19 }
 0x1c8   :  { %v515_v63 = vpack.c.bf16 %v567_v21, %v567_v21  ;;  %v569_v53 = vpop.eup %568  ;;  %578 = vtanh.f32 %v395_v18 }
 0x1c9   :  { %v513_v2 = vpack.c.bf16 %v569_v53, %v569_v53 }
 0x1ca   :  { %448 = vrot.lane.b32.xlu0 %v515_v63, %s610_s7 }
 0x1cb   :  { %v571_v23 = vpop.eup %570 }
 0x1cc   :  { %v517_v27 = vpack.c.bf16 %v571_v23, %v571_v23 }
 0x1ce   :  { %444 = vrot.lane.b32.xlu0 %v513_v2, %s610_s7 }
 0x1cf   :  { %v573_v24 = vpop.eup %572 }
 0x1d0   :  { %v575_v25 = vpop.eup %574  ;;  %v514_v26 = vpack.c.bf16 %v573_v24, %v573_v24 }
 0x1d1   :  { %v577_v28 = vpop.eup %576  ;;  %v518_v29 = vpack.c.bf16 %v575_v25, %v575_v25 }
 0x1d2   :  { %446 = vrot.lane.b32.xlu1 %v514_v26, %s610_s7  ;;  %452 = vrot.lane.b32.xlu0 %v517_v27, %s610_s7  ;;  %v519_v30 = vpack.c.bf16 %v577_v28, %v577_v28  ;;  %v579_v31 = vpop.eup %578 }
 0x1d3   :  { %v520_v32 = vpack.c.bf16 %v579_v31, %v579_v31 }
 0x1d6   :  { %454 = vrot.lane.b32.xlu1 %v518_v29, %s610_s7  ;;  %456 = vrot.lane.b32.xlu0 %v519_v30, %s610_s7 }
 0x1da   :  { %458 = vrot.lane.b32.xlu1 %v520_v32, %s610_s7 }
 0x20c   :  { %v451_v33 = vpop.permute.xlu1 %450 }
 0x20d   :  { %472 = vst.msk [vmem:[#allocation2 + $0xc] sm:$0xf] %vm468_vm1, %v451_v33 }
 0x23c   :  { %v449_v34 = vpop.permute.xlu0 %448 }
 0x23d   :  { %471 = vst.msk [vmem:[#allocation2 + $0x8] sm:$0xf] %vm468_vm1, %v449_v34 }
 0x240   :  { %v445_v35 = vpop.permute.xlu0 %444 }
 0x241   :  { %469 = vst.msk [vmem:[#allocation2] sm:$0xf] %vm468_vm1, %v445_v35 }
 0x244   :  { %v447_v37 = vpop.permute.xlu1 %446  ;;  %v453_v38 = vpop.permute.xlu0 %452 }
 0x245   :  { %470 = vst.msk [vmem:[#allocation2 + $0x4] sm:$0xf] %vm468_vm1, %v447_v37  ;;  %473 = vst.msk [vmem:[#allocation2 + $0x10] sm:$0xf] %vm468_vm1, %v453_v38 }
 0x248   :  { %v455_v39 = vpop.permute.xlu1 %454  ;;  %v457_v40 = vpop.permute.xlu0 %456 }
 0x249   :  { %474 = vst.msk [vmem:[#allocation2 + $0x14] sm:$0xf] %vm468_vm1, %v455_v39  ;;  %475 = vst.msk [vmem:[#allocation2 + $0x18] sm:$0xf] %vm468_vm1, %v457_v40 }
 0x24c   :  { %v459_v42 = vpop.permute.xlu1 %458 }
 0x24d   :  { %476 = vst.msk [vmem:[#allocation2 + $0x1c] sm:$0xf] %vm468_vm1, %v459_v42 }
 0x24e   :  { %591 = shalt.err (!%p588_p4)
}
 0x24f   :  { %s592_s23 = scalar_lea.hbm %s879_s4, 512 }
 0x250   :  { %p593_p5 = scmp.ne.s32.totalorder %s879_s4, %s592_s23  ;;  %p596_p6 = scmp.lt.u32.totalorder %s592_s23, %s879_s4 }
 0x252   :  { %p598_p7 = pnand %p596_p6, %p593_p5 }
 0x254   :  { %601 = shalt.err (!%p598_p7)
}
 0x255   :  { %s612_s27 = smov 4  }
 0x256   :  { %488 = dma.vmem_to_hbm [thread:$0]  %s483_s19, 512, %s879_s4, [#allocation3], %s607_s30, %s607_s30, %s612_s27  }
 0x257   :  { %602 = dma.done.wait [#allocation3], 512  }
 0x258   :  { %603 = vsyncadd [#allocation3], 4294966784 }
 0x259   :  { %492 = vsyncpa [#allocation3], 1 }

</bundles_post_ra>
